<compile_context>
chip_gen: v6e
topology: v6e:2x2x1
jax: 0.10.0
libtpu: 0.0.40
codegen_flags: <defaults>
</compile_context>

<pallas_src>
import jax
import jax.numpy as jnp
from jax.experimental import pallas as pl
from jax.experimental.pallas import tpu as pltpu

LANE = 128


def _round_up(n, m):
    return ((n + m - 1) // m) * m


def _cdiv(a, b):
    return (a + b - 1) // b


def _num_tensorcores():
    """Best-effort: 2 TensorCores per chip on v7x, 1 on v5e/v6e."""
    try:
        kind = jax.devices()[0].device_kind.lower()
        if "v7" in kind or "7x" in kind:
            return 2
    except Exception:
        pass
    return 1


def _make_qnet_kernel(num_hidden):
    """Kernel refs: (x, w0, b0, ..., w_{L-1}, b_{L-1}, w_head, b_head, out)."""

    def kernel(*refs):
        x_ref = refs[0]
        o_ref = refs[-1]
        wb = refs[1:-1]

        h = x_ref[...].astype(jnp.bfloat16)          # (TB, state_dim) bf16
        for l in range(num_hidden):
            w = wb[2 * l][...]                       # bf16 [in_pad, out_pad]
            b = wb[2 * l + 1][...]                   # f32  [1, out_pad]
            h32 = jnp.dot(h, w, preferred_element_type=jnp.float32) + b
            # ReLU in f32 (v5e has no bf16 VPU), then carry h as bf16 vregs so the next
            # matmul needs no standalone cast and live activation footprint is halved.
            h = jnp.maximum(h32, 0.0).astype(jnp.bfloat16)  # padded lanes stay exactly 0
        wh = wb[2 * num_hidden][...]
        bh = wb[2 * num_hidden + 1][...]
        out = jnp.dot(h, wh, preferred_element_type=jnp.float32) + bh
        o_ref[...] = out.astype(o_ref.dtype)

    return kernel


def prepare_qnet_params(params):
    """Pad + bf16-cast parameters ONCE (cache across calls).

    params = ((w0, b0), ..., (wh, bh)); weights [in, out] (transpose of PyTorch),
    biases [1, out].  Returns (flat_params, meta).
    """
    num_hidden = len(params) - 1
    state_dim = params[0][0].shape[0]
    action_dim = params[-1][0].shape[1]

    # First layer keeps K = state_dim (no lane padding on x); deeper layers pad the
    # in-dim to the previous layer's lane-padded out-dim.
    in_dims = [state_dim] + [_round_up(w.shape[1], LANE) for (w, _) in params[:-1]]

    flat, shapes = [], []
    for li, (w, b) in enumerate(params):
        in_p = in_dims[li]
        out_p = _round_up(w.shape[1], LANE)
        w_p = jnp.pad(w, ((0, in_p - w.shape[0]), (0, out_p - w.shape[1]))).astype(jnp.bfloat16)
        b_p = jnp.pad(b, ((0, 0), (0, out_p - b.shape[1]))).astype(jnp.float32)
        flat += [w_p, b_p]
        shapes += [(in_p, out_p), (1, out_p)]

    meta = dict(
        num_hidden=num_hidden,
        state_dim=state_dim,
        action_dim=action_dim,
        out_cols=_round_up(action_dim, LANE),
        shapes=tuple(shapes),
    )
    return tuple(flat), meta


def qnet_forward(x, flat_params, meta, *, batch_tile=512,
                 out_dtype=jnp.float32, slice_output=True):
    """Run the fused QNet forward pass. flat_params/meta come from prepare_qnet_params."""
    B, state_dim = x.shape
    assert state_dim == meta["state_dim"], "state_dim mismatch vs prepared params"
    num_hidden = meta["num_hidden"]
    action_dim = meta["action_dim"]
    out_cols = meta["out_cols"]

    out_dtype = jnp.dtype(out_dtype)
    # Sublane tile: 8 for f32 output blocks, 16 for bf16 (packed rows).
    sub = 16 if out_dtype == jnp.dtype(jnp.bfloat16) else 8

    tb = min(_round_up(batch_tile, sub), _round_up(B, sub))
    num_tc = _num_tensorcores()
    if num_tc > 1 and B >= 2 * num_tc * sub:
        # v7x: make sure the "parallel" batch axis has >= num_tc grid steps so both
        # TensorCores get work; no-op on single-TC chips.
        tb = min(tb, _round_up(_cdiv(_round_up(B, sub), num_tc), sub))
    b_pad = _round_up(B, tb)

    x_in = x.astype(jnp.float32)
    if b_pad != B:
        x_in = jnp.pad(x_in, ((0, b_pad - B), (0, 0)))

    grid = (b_pad // tb,)
    in_specs = [pl.BlockSpec((tb, state_dim), lambda i: (i, 0))]       # batch-tiled x (f32, true width)
    for shp in meta["shapes"]:
        in_specs.append(pl.BlockSpec(shp, lambda i: (0, 0)))           # VMEM-resident weights/biases

    # VMEM budget: resident params are double-buffered by default; add x/out tile
    # double-buffers; cap at v7x physical VMEM (64 MiB).
    param_bytes = sum(int(p.size) * p.dtype.itemsize for p in flat_params)
    io_bytes = tb * state_dim * 4 + tb * out_cols * out_dtype.itemsize
    vmem_limit = int(min(max(4 * (param_bytes + io_bytes), 32 << 20), 64 << 20))

    out_padded = pl.pallas_call(
        _make_qnet_kernel(num_hidden),
        out_shape=jax.ShapeDtypeStruct((b_pad, out_cols), out_dtype),
        grid=grid,
        in_specs=in_specs,
        out_specs=pl.BlockSpec((tb, out_cols), lambda i: (i, 0)),      # lane-dense store
        compiler_params=pltpu.CompilerParams(
            dimension_semantics=("parallel",),
            vmem_limit_bytes=vmem_limit),
    )(x_in, *flat_params)

    if not slice_output:
        # Padded action lanes are exactly 0 and padded batch rows are garbage-free
        # (zero inputs -> bias-only rows); callers doing argmax should restrict to the
        # first action_dim lanes.
        return out_padded
    return out_padded[:B, :action_dim]


def init_qnet_params(key, state_dim, hidden_layers_dim, action_dim):
    """Mimics PyTorch nn.Linear default init: U(-1/sqrt(fan_in), 1/sqrt(fan_in))."""
    dims = [state_dim] + list(hidden_layers_dim) + [action_dim]
    params = []
    for i in range(len(dims) - 1):
        fan_in, fan_out = dims[i], dims[i + 1]
        key, kw, kb = jax.random.split(key, 3)
        bound = 1.0 / jnp.sqrt(jnp.float32(fan_in))
        w = jax.random.uniform(kw, (fan_in, fan_out), jnp.float32, -bound, bound)
        b = jax.random.uniform(kb, (1, fan_out), jnp.float32, -bound, bound)
        params.append((w, b))
    return tuple(params)


def qnet_reference(x, params):
    """Pure-JAX f32 reference of the same forward pass."""
    h = x
    for (w, b) in params[:-1]:
        h = jnp.maximum(h @ w + b, 0.0)
    wh, bh = params[-1]
    return h @ wh + bh


if __name__ == "__main__":
    # QNet(state_dim=16, hidden_layers_dim=[32, 32], action_dim=4), batch=8
    state_dim = 16
    hidden_layers_dim = [32, 32]
    action_dim = 4
    batch = 8

    key = jax.random.PRNGKey(0)
    key, kx = jax.random.split(key)
    x = jax.random.normal(kx, (batch, state_dim), jnp.float32)

    params = init_qnet_params(key, state_dim, hidden_layers_dim, action_dim)

    # Pad/cast parameters once (amortized across training steps).
    flat_params, meta = prepare_qnet_params(params)

    out = jax.block_until_ready(qnet_forward(x, flat_params, meta))
    ref = qnet_reference(x, params)

    assert out.shape == (batch, action_dim)
    # bf16 MXU inputs with f32 accumulation -> compare against the f32 reference at
    # bf16-appropriate tolerance.
    assert jnp.allclose(out, ref, atol=2e-2, rtol=2e-2), "Pallas output mismatch vs reference"

    print("KERNEL_OK")
</pallas_src>

<mosaic_0001>
module attributes {stable_mosaic.version = 11 : i64} {
  func.func @kernel(%arg0: i32, %arg1: memref<8x16xf32, #tpu.memory_space<vmem>>, %arg2: memref<16x128xbf16, #tpu.memory_space<vmem>>, %arg3: memref<1x128xf32, #tpu.memory_space<vmem>>, %arg4: memref<128x128xbf16, #tpu.memory_space<vmem>>, %arg5: memref<1x128xf32, #tpu.memory_space<vmem>>, %arg6: memref<128x128xbf16, #tpu.memory_space<vmem>>, %arg7: memref<1x128xf32, #tpu.memory_space<vmem>>, %arg8: memref<8x128xf32, #tpu.memory_space<vmem>>) attributes {dimension_semantics = [#tpu.dimension_semantics<parallel>], iteration_bounds = array<i64: 1>, scalar_prefetch = 0 : i64, scratch_operands = 0 : i64, tpu.core_type = #tpu.core_type<tc>, window_params = [{transform_indices = @transform_0, window_bounds = array<i64: 8, 16>}, {pipeline_mode = #tpu.pipeline_mode<synchronous>, transform_indices = @transform_1, window_bounds = array<i64: 16, 128>}, {pipeline_mode = #tpu.pipeline_mode<synchronous>, transform_indices = @transform_2, window_bounds = array<i64: 1, 128>}, {pipeline_mode = #tpu.pipeline_mode<synchronous>, transform_indices = @transform_3, window_bounds = array<i64: 128, 128>}, {pipeline_mode = #tpu.pipeline_mode<synchronous>, transform_indices = @transform_4, window_bounds = array<i64: 1, 128>}, {pipeline_mode = #tpu.pipeline_mode<synchronous>, transform_indices = @transform_5, window_bounds = array<i64: 128, 128>}, {pipeline_mode = #tpu.pipeline_mode<synchronous>, transform_indices = @transform_6, window_bounds = array<i64: 1, 128>}, {transform_indices = @transform_7, window_bounds = array<i64: 8, 128>}]} {
    %c0 = arith.constant 0 : index
    %c0_0 = arith.constant 0 : index
    %0 = vector.load %arg1[%c0, %c0_0] : memref<8x16xf32, #tpu.memory_space<vmem>>, vector<8x16xf32>
    %1 = arith.truncf %0 : vector<8x16xf32> to vector<8x16xbf16>
    %c0_1 = arith.constant 0 : index
    %c0_2 = arith.constant 0 : index
    %2 = vector.load %arg2[%c0_1, %c0_2] : memref<16x128xbf16, #tpu.memory_space<vmem>>, vector<16x128xbf16>
    %c0_3 = arith.constant 0 : index
    %c0_4 = arith.constant 0 : index
    %3 = vector.load %arg3[%c0_3, %c0_4] : memref<1x128xf32, #tpu.memory_space<vmem>>, vector<1x128xf32>
    %cst = arith.constant dense<0.000000e+00> : vector<8x128xf32>
    %4 = tpu.matmul %1, %2, %cst {dimension_numbers = #tpu.dot_dimension_numbers<[1], [0], [0], [1], [0, 0, 1, 1], [], []>} : vector<8x16xbf16>, vector<16x128xbf16>, vector<8x128xf32> -> vector<8x128xf32>
    %5 = vector.broadcast %3 : vector<1x128xf32> to vector<8x128xf32>
    %6 = arith.addf %4, %5 : vector<8x128xf32>
    %cst_5 = arith.constant 0.000000e+00 : f32
    %7 = vector.broadcast %cst_5 : f32 to vector<8x128xf32>
    %8 = arith.maximumf %6, %7 : vector<8x128xf32>
    %9 = arith.truncf %8 : vector<8x128xf32> to vector<8x128xbf16>
    %c0_6 = arith.constant 0 : index
    %c0_7 = arith.constant 0 : index
    %10 = vector.load %arg4[%c0_6, %c0_7] : memref<128x128xbf16, #tpu.memory_space<vmem>>, vector<128x128xbf16>
    %c0_8 = arith.constant 0 : index
    %c0_9 = arith.constant 0 : index
    %11 = vector.load %arg5[%c0_8, %c0_9] : memref<1x128xf32, #tpu.memory_space<vmem>>, vector<1x128xf32>
    %cst_10 = arith.constant dense<0.000000e+00> : vector<8x128xf32>
    %12 = tpu.matmul %9, %10, %cst_10 {dimension_numbers = #tpu.dot_dimension_numbers<[1], [0], [0], [1], [0, 0, 1, 1], [], []>} : vector<8x128xbf16>, vector<128x128xbf16>, vector<8x128xf32> -> vector<8x128xf32>
    %13 = vector.broadcast %11 : vector<1x128xf32> to vector<8x128xf32>
    %14 = arith.addf %12, %13 : vector<8x128xf32>
    %cst_11 = arith.constant 0.000000e+00 : f32
    %15 = vector.broadcast %cst_11 : f32 to vector<8x128xf32>
    %16 = arith.maximumf %14, %15 : vector<8x128xf32>
    %17 = arith.truncf %16 : vector<8x128xf32> to vector<8x128xbf16>
    %c0_12 = arith.constant 0 : index
    %c0_13 = arith.constant 0 : index
    %18 = vector.load %arg6[%c0_12, %c0_13] : memref<128x128xbf16, #tpu.memory_space<vmem>>, vector<128x128xbf16>
    %c0_14 = arith.constant 0 : index
    %c0_15 = arith.constant 0 : index
    %19 = vector.load %arg7[%c0_14, %c0_15] : memref<1x128xf32, #tpu.memory_space<vmem>>, vector<1x128xf32>
    %cst_16 = arith.constant dense<0.000000e+00> : vector<8x128xf32>
    %20 = tpu.matmul %17, %18, %cst_16 {dimension_numbers = #tpu.dot_dimension_numbers<[1], [0], [0], [1], [0, 0, 1, 1], [], []>} : vector<8x128xbf16>, vector<128x128xbf16>, vector<8x128xf32> -> vector<8x128xf32>
    %21 = vector.broadcast %19 : vector<1x128xf32> to vector<8x128xf32>
    %22 = arith.addf %20, %21 : vector<8x128xf32>
    %c0_17 = arith.constant 0 : index
    %c0_18 = arith.constant 0 : index
    %23 = vector.load %arg8[%c0_17, %c0_18] : memref<8x128xf32, #tpu.memory_space<vmem>>, vector<8x128xf32>
    tpu.vector_store %arg8[%c0_17, %c0_18], %22 {strides = array<i32>} : memref<8x128xf32, #tpu.memory_space<vmem>>, vector<8x128xf32>,
    return
  }
  func.func @transform_0(%arg0: i32) -> (i32, i32) {
    %c0_i32 = arith.constant 0 : i32
    %c0_i32_0 = arith.constant 0 : i32
    return %arg0, %c0_i32 : i32, i32
  }
  func.func @transform_1(%arg0: i32) -> (i32, i32) {
    %c0_i32 = arith.constant 0 : i32
    %c0_i32_0 = arith.constant 0 : i32
    %c0_i32_1 = arith.constant 0 : i32
    return %c0_i32, %c0_i32_0 : i32, i32
  }
  func.func @transform_2(%arg0: i32) -> (i32, i32) {
    %c0_i32 = arith.constant 0 : i32
    %c0_i32_0 = arith.constant 0 : i32
    %c0_i32_1 = arith.constant 0 : i32
    return %c0_i32, %c0_i32_0 : i32, i32
  }
  func.func @transform_3(%arg0: i32) -> (i32, i32) {
    %c0_i32 = arith.constant 0 : i32
    %c0_i32_0 = arith.constant 0 : i32
    %c0_i32_1 = arith.constant 0 : i32
    return %c0_i32, %c0_i32_0 : i32, i32
  }
  func.func @transform_4(%arg0: i32) -> (i32, i32) {
    %c0_i32 = arith.constant 0 : i32
    %c0_i32_0 = arith.constant 0 : i32
    %c0_i32_1 = arith.constant 0 : i32
    return %c0_i32, %c0_i32_0 : i32, i32
  }
  func.func @transform_5(%arg0: i32) -> (i32, i32) {
    %c0_i32 = arith.constant 0 : i32
    %c0_i32_0 = arith.constant 0 : i32
    %c0_i32_1 = arith.constant 0 : i32
    return %c0_i32, %c0_i32_0 : i32, i32
  }
  func.func @transform_6(%arg0: i32) -> (i32, i32) {
    %c0_i32 = arith.constant 0 : i32
    %c0_i32_0 = arith.constant 0 : i32
    %c0_i32_1 = arith.constant 0 : i32
    return %c0_i32, %c0_i32_0 : i32, i32
  }
  func.func @transform_7(%arg0: i32) -> (i32, i32) {
    %c0_i32 = arith.constant 0 : i32
    %c0_i32_0 = arith.constant 0 : i32
    return %arg0, %c0_i32 : i32, i32
  }
}

</mosaic_0001>

<bundles_post_ra>
// kernel: tpu_custom_call.1
= control target key start
LH: loop header
LB: loop body
LE: loop exit
PB: predicated region body
PF: predicated region fallthrough
CT: control target
= control target key end

     0   :  { %12 = vsyncpa [#allocation3], 0  ;;  %s709_s0 = inlined_call_operand.hbm [shape: f32[8,16], index: 0, kind: input, shape index: {}]   ;;  %s710_s1 = inlined_call_operand.hbm [shape: bf16[16,128], index: 1, kind: input, shape index: {}]   ;;  %s711_s2 = inlined_call_operand.vmem [shape: f32[1,128], index: 2, kind: input, shape index: {}]   ;;  %s712_s3 = inlined_call_operand.hbm [shape: bf16[128,128], index: 3, kind: input, shape index: {}]   ;;  %s713_s4 = inlined_call_operand.vmem [shape: f32[1,128], index: 4, kind: input, shape index: {}]   ;;  %s714_s5 = inlined_call_operand.hbm [shape: bf16[128,128], index: 5, kind: input, shape index: {}]   ;;  %s715_s6 = inlined_call_operand.vmem [shape: f32[1,128], index: 6, kind: input, shape index: {}]   ;;  %s716_s7 = inlined_call_operand.hbm [shape: f32[8,128], index: 7, kind: output, shape index: {}]  }
   0x1   :  { %13 = vsyncpa [#allocation6], 0 }
   0x2   :  { %14 = vsyncpa [#allocation9], 0 }
   0x3   :  { %15 = vsyncpa [#allocation4], 0  ;;  %s607_s24 = smov [#allocation5]  }
   0x4   :  { %s31_s25 = sshll.u32 %s607_s24, 4  ;;  %s32_s25 = int_to_ptr.vmem [resolvable:$true] %s31_s25 }
   0x5   :  { %s507_s26 = scalar_lea.vmem %s32_s25, 128  ;;  %p512_p1 = scmp.lt.s32.totalorder %s32_s25, %s32_s25 }
   0x6   :  { %p508_p0 = scmp.ne.s32.totalorder %s32_s25, %s507_s26  ;;  %p513_p2 = scmp.lt.s32.totalorder %s507_s26, %s507_s26 }
   0x8   :  { %p514_p3 = por %p513_p2, %p512_p1 }
   0xa   :  { %p515_p4 = pnand %p514_p3, %p508_p0 }
   0xc   :  { %518 = shalt.err (!%p515_p4)
}
   0xd   :  { %s608_s27 = smov 64   ;;  %s609_s28 = smov 4  }
   0xe   :  { %37 = dma.hbm_to_vmem [thread:$0]  %s710_s1, 128, %s32_s25, [#allocation6], %s608_s27, %s608_s27, %s609_s28  }
   0xf   :  { %s610_s8 = smov [#allocation2]   ;;  %s611_s10 = smov [#allocation7]  }
  0x10   :  { %s22_s9 = sshll.u32 %s610_s8, 4  ;;  %s45_s11 = sshll.u32 %s611_s10, 4  ;;  %s23_s9 = int_to_ptr.vmem [resolvable:$true] %s22_s9  ;;  %s46_s11 = int_to_ptr.vmem [resolvable:$true] %s45_s11 }
  0x11   :  { %s527_s12 = scalar_lea.vmem %s23_s9, 128  ;;  %p532_p6 = scmp.lt.s32.totalorder %s23_s9, %s23_s9 }
  0x12   :  { %p528_p5 = scmp.ne.s32.totalorder %s23_s9, %s527_s12  ;;  %p533_p7 = scmp.lt.s32.totalorder %s527_s12, %s527_s12 }
  0x14   :  { %p534_p8 = por %p533_p7, %p532_p6 }
  0x16   :  { %p535_p9 = pnand %p534_p8, %p528_p5 }
  0x18   :  { %538 = shalt.err (!%p535_p9)
}
  0x19   :  { %25 = dma.hbm_to_vmem [thread:$0]  %s709_s0, 128, %s23_s9, [#allocation3]  }
  0x1a   :  { %s547_s15 = scalar_lea.vmem %s46_s11, 1024  ;;  %p552_p11 = scmp.lt.s32.totalorder %s46_s11, %s46_s11 }
  0x1b   :  { %p548_p10 = scmp.ne.s32.totalorder %s46_s11, %s547_s15  ;;  %p553_p12 = scmp.lt.s32.totalorder %s547_s15, %s547_s15 }
  0x1d   :  { %p554_p13 = por %p553_p12, %p552_p11 }
  0x1f   :  { %p555_p0 = pnand %p554_p13, %p548_p10 }
  0x21   :  { %558 = shalt.err (!%p555_p0)
}
  0x22   :  { %51 = dma.hbm_to_vmem [thread:$0]  %s712_s3, 1024, %s46_s11, [#allocation6], %s608_s27, %s608_s27, %s609_s28  }
  0x23   :  { %s612_s17 = smov [#allocation8]  }
  0x24   :  { %s59_s18 = sshll.u32 %s612_s17, 4  ;;  %s60_s18 = int_to_ptr.vmem [resolvable:$true] %s59_s18 }
  0x25   :  { %s567_s19 = scalar_lea.vmem %s60_s18, 1024  ;;  %p572_p2 = scmp.lt.s32.totalorder %s60_s18, %s60_s18 }
  0x26   :  { %p568_p1 = scmp.ne.s32.totalorder %s60_s18, %s567_s19  ;;  %p573_p3 = scmp.lt.s32.totalorder %s567_s19, %s567_s19 }
  0x28   :  { %p574_p4 = por %p573_p3, %p572_p2 }
  0x2a   :  { %p575_p5 = pnand %p574_p4, %p568_p1 }
  0x2c   :  { %578 = shalt.err (!%p575_p5)
}
  0x2d   :  { %65 = dma.hbm_to_vmem [thread:$0]  %s714_s5, 1024, %s60_s18, [#allocation9], %s608_s27, %s608_s27, %s609_s28  }
  0x2e   :  { %599 = dma.done.wait [#allocation3], 128  }
  0x2f   :  { %600 = vsyncadd [#allocation3], 4294967168 }
  0x30   :  { %601 = dma.done.wait [#allocation6], 1152  }
  0x31   :  { %602 = vsyncadd [#allocation6], 4294966144 }
  0x32   :  { %603 = dma.done.wait [#allocation9], 1024  }
  0x33   :  { %604 = vsyncadd [#allocation9], 4294966272  ;;  %v613_v0 = vmov 0.0   ;;  %vm614_vm0 = vmmov 0   ;;  %v482_v1 = vld [vmem:[#allocation5] sm:$0xff]   ;;  %v81_v2 = vld [vmem:[#allocation2] sm:$0xff] }
  0x34   :  { %427 = vmatprep.subr.bf16.mxu0 %v613_v0  ;;  %429 = vmatprep.mubr.msk.bf16.mxu0 %vm614_vm0, %v613_v0  ;;  %v82_v3 = vpack.c.bf16 %v81_v2, %v81_v2  ;;  %vm98_vm1 = vcmask 130048   ;;  %v483_v4 = vld [vmem:[#allocation7 + $0x38] sm:$0xff]   ;;  %v484_v5 = vld [vmem:[#allocation7 + $0x30] sm:$0xff]   ;;  %v485_v6 = vld [vmem:[#allocation7 + $0x28] sm:$0xff]   ;;  %s615_s24 = smov [#allocation10]  }
  0x35   :  { %433 = vmatprep.subr.bf16.mxu1 %v613_v0  ;;  %449 = vmatprep.mubr.msk.bf16.mxu1 %vm614_vm0, %v613_v0  ;;  %v486_v7 = vld [vmem:[#allocation7 + $0x20] sm:$0xff]   ;;  %v487_v8 = vld [vmem:[#allocation7 + $0x18] sm:$0xff]   ;;  %v488_v9 = vld [vmem:[#allocation7 + $0x10] sm:$0xff]   ;;  %s375_s25 = sshll.u32 %s615_s24, 4  ;;  %s376_s25 = int_to_ptr.vmem [resolvable:$true] %s375_s25 }
  0x36   :  { %428 = vmatpush3.bf16.msra.mxu0 %v482_v1  ;;  %434 = vmatpush3.bf16.msra.mxu1 %v483_v4  ;;  %v489_v10 = vld [vmem:[#allocation7 + $0x8] sm:$0xff]   ;;  %v490_v11 = vld [vmem:[#allocation7] sm:$0xff]   ;;  %v491_v12 = vld [vmem:[#allocation8 + $0x38] sm:$0xff]   ;;  %p584_p7 = scmp.lt.s32.totalorder %s376_s25, %s376_s25 }
  0x37   :  { %453 = vmatprep.subr.bf16.mxu0 %v613_v0  ;;  %435 = vmatprep.subr.bf16.mxu1 %v613_v0  ;;  %v492_v13 = vld [vmem:[#allocation8 + $0x30] sm:$0xff]   ;;  %v493_v14 = vld [vmem:[#allocation8 + $0x28] sm:$0xff]   ;;  %v494_v15 = vld [vmem:[#allocation8 + $0x20] sm:$0xff]  }
  0x38   :  { %v495_v16 = vld [vmem:[#allocation8 + $0x18] sm:$0xff]   ;;  %v496_v17 = vld [vmem:[#allocation8 + $0x10] sm:$0xff]   ;;  %v497_v26 = vld [vmem:[#allocation8 + $0x8] sm:$0xff]  }
  0x39   :  { %430 = vmatmul.mubr.msk.bf16.vlgmr.msra.gmra.mxu0 %vm98_vm1, %v82_v3  ;;  %v386_v18 = vld [vmem:[%s711_s2] ss:$0 sm:$0xff]  ;;  %v498_v27 = vld [vmem:[#allocation8] sm:$0xff]  }
  0x3a   :  { %469 = vmatprep.mubr.msk.bf16.mxu0 %vm614_vm0, %v613_v0  ;;  %436 = vmatpush3.bf16.msra.mxu1 %v484_v5  ;;  %v389_v28 = vld [vmem:[%s713_s4] ss:$0 sm:$0xff]  ;;  %s579_s4 = scalar_lea.vmem %s376_s25, 128 }
  0x3b   :  { %437 = vmatprep.subr.bf16.mxu1 %v613_v0  ;;  %454 = vmatpush3.bf16.msra.mxu0 %v491_v12  ;;  %v398_v36 = vld [vmem:[%s715_s6] ss:$0 sm:$0xff]  ;;  %p580_p6 = scmp.ne.s32.totalorder %s376_s25, %s579_s4  ;;  %p585_p8 = scmp.lt.s32.totalorder %s579_s4, %s579_s4 }
  0x3c   :  { %455 = vmatprep.subr.bf16.mxu0 %v613_v0 }
  0x3d   :  { %p586_p9 = por %p585_p8, %p584_p7 }
  0x3e   :  { %438 = vmatpush3.bf16.msra.mxu1 %v485_v6 }
  0x3f   :  { %439 = vmatprep.subr.bf16.mxu1 %v613_v0  ;;  %456 = vmatpush3.bf16.msra.mxu0 %v492_v13  ;;  %p587_p10 = pnand %p586_p9, %p580_p6 }
  0x40   :  { %457 = vmatprep.subr.bf16.mxu0 %v613_v0 }
  0x42   :  { %440 = vmatpush3.bf16.msra.mxu1 %v486_v7 }
  0x43   :  { %441 = vmatprep.subr.bf16.mxu1 %v613_v0  ;;  %458 = vmatpush3.bf16.msra.mxu0 %v493_v14 }
  0x44   :  { %459 = vmatprep.subr.bf16.mxu0 %v613_v0 }
  0x46   :  { %442 = vmatpush3.bf16.msra.mxu1 %v487_v8 }
  0x47   :  { %443 = vmatprep.subr.bf16.mxu1 %v613_v0  ;;  %460 = vmatpush3.bf16.msra.mxu0 %v494_v15 }
  0x48   :  { %461 = vmatprep.subr.bf16.mxu0 %v613_v0 }
  0x4a   :  { %444 = vmatpush3.bf16.msra.mxu1 %v488_v9 }
  0x4b   :  { %445 = vmatprep.subr.bf16.mxu1 %v613_v0  ;;  %462 = vmatpush3.bf16.msra.mxu0 %v495_v16 }
  0x4c   :  { %463 = vmatprep.subr.bf16.mxu0 %v613_v0 }
  0x4e   :  { %446 = vmatpush3.bf16.msra.mxu1 %v489_v10 }
  0x4f   :  { %447 = vmatprep.subr.bf16.mxu1 %v613_v0  ;;  %464 = vmatpush3.bf16.msra.mxu0 %v496_v17 }
  0x50   :  { %465 = vmatprep.subr.bf16.mxu0 %v613_v0 }
  0x52   :  { %448 = vmatpush3.bf16.msra.mxu1 %v490_v11 }
  0x53   :  { %466 = vmatpush3.bf16.msra.mxu0 %v497_v26 }
  0x54   :  { %467 = vmatprep.subr.bf16.mxu0 %v613_v0 }
  0x57   :  { %468 = vmatpush3.bf16.msra.mxu0 %v498_v27 }
  0xf9   :  { %v136_v19 = vpop.f32.mrf.mxu0 }
  0xfa   :  { %v137_v20 = vadd.f32 %v386_v18, %v136_v19 }
  0xfb   :  { %v431_v21 = vpop.f32.mrf.mxu0 }
  0xfc   :  { %v142_v22 = vmax.f32 %v137_v20, 0.0 }
  0xfd   :  { %v139_v23 = vpop.f32.mrf.mxu0 }
  0xfe   :  { %v143_v24 = vpack.c.bf16 %v142_v22, %v142_v22 }
  0xff   :  { %v432_v25 = vpop.f32.mrf.mxu0 }
 0x100   :  { %450 = vmatmul.mubr.bf16.vlgmr.msra.gmra.mxu1 %v143_v24 }
 0x1c0   :  { %v249_v29 = vpop.f32.mrf.mxu1 }
 0x1c1   :  { %v250_v30 = vadd.f32 %v389_v28, %v249_v29 }
 0x1c2   :  { %v451_v31 = vpop.f32.mrf.mxu1 }
 0x1c3   :  { %v255_v32 = vmax.f32 %v250_v30, 0.0 }
 0x1c4   :  { %v252_v33 = vpop.f32.mrf.mxu1 }
 0x1c5   :  { %v256_v34 = vpack.c.bf16 %v255_v32, %v255_v32 }
 0x1c6   :  { %v452_v35 = vpop.f32.mrf.mxu1 }
 0x1c7   :  { %470 = vmatmul.mubr.bf16.vlgmr.msra.gmra.mxu0 %v256_v34 }
 0x287   :  { %v362_v37 = vpop.f32.mrf.mxu0 }
 0x288   :  { %v363_v38 = vadd.f32 %v398_v36, %v362_v37 }
 0x289   :  { %v471_v39 = vpop.f32.mrf.mxu0 }
 0x28a   :  { %368 = vst [vmem:[#allocation10] sm:$0xff] %v363_v38 }
 0x28b   :  { %v365_v40 = vpop.f32.mrf.mxu0 }
 0x28c   :  { %590 = shalt.err (!%p587_p10)
}
 0x28d   :  { %378 = dma.vmem_to_hbm [thread:$0]  %s376_s25, 128, %s716_s7, [#allocation4]   ;;  %v472_v41 = vpop.f32.mrf.mxu0 }
 0x28e   :  { %605 = dma.done.wait [#allocation4], 128  }
 0x28f   :  { %606 = vsyncadd [#allocation4], 4294967168 }
 0x290   :  { %382 = vsyncpa [#allocation3], 1 }
 0x291   :  { %383 = vsyncpa [#allocation6], 1 }
 0x292   :  { %384 = vsyncpa [#allocation9], 1 }
 0x293   :  { %385 = vsyncpa [#allocation4], 1 }

</bundles_post_ra>
